<compile_context>
chip_gen: v5e
topology: v5e:2x2
jax: 0.10.0
libtpu: 0.0.40
codegen_flags: <defaults>
</compile_context>

<pallas_src>
import functools

import jax
import jax.numpy as jnp
from jax.experimental import pallas as pl
from jax.experimental.pallas import tpu as pltpu

_LANE = 128             # lane width: last-dim alignment target
_ROW_ALIGN = 16         # batch-row alignment (bf16 native (16,128) tiling)
_MAX_BATCH_TILE = 1024  # absolute cap on rows per grid step
_TILE_VMEM_BUDGET = 8 << 20  # VMEM budget for the pipelined activation tiles


def _round_up(x, m):
    return ((x + m - 1) // m) * m


def _fused_mlp_kernel(*refs, n_layers):
    """refs = (x_ref, w0_ref, b0_ref, w1_ref, b1_ref, ..., o_ref).

    x_ref: bf16 (tm, In_pad); w_i: bf16 (In_pad_i, Out_pad_i);
    b_i: f32 (1, Out_pad_i); o_ref: f32 (tm, Out_pad_last).
    All feature dims are multiples of 128 -> every matmul/store is lane-dense.
    Zero padding is exact: padded input columns hit zero weight rows, padded
    bias entries are zero, ReLU(0) = 0.  Matmuls run bf16 x bf16 -> f32 acc.
    """
    x_ref = refs[0]
    o_ref = refs[-1]
    h = x_ref[...]                                  # bf16 activations
    for i in range(n_layers):
        w_ref = refs[1 + 2 * i]
        b_ref = refs[2 + 2 * i]
        z = jnp.dot(h, w_ref[...], preferred_element_type=jnp.float32)
        z = z + b_ref[...]                          # f32 bias, (1, Out_pad) bcast
        if i < n_layers - 1:
            h = jnp.maximum(z, 0.0).astype(jnp.bfloat16)  # ReLU, back to bf16
        else:
            o_ref[...] = z.astype(o_ref.dtype)


def pack_params(params):
    """One-time preprocessing (NOT in the forward path): transpose
    PyTorch-style (Out, In) weights to (In, Out), zero-pad every feature dim
    to a multiple of 128, and store weights in bf16 (biases stay f32)."""
    packed = []
    for w, b in params:
        out_f, in_f = w.shape
        in_p = _round_up(in_f, _LANE)
        out_p = _round_up(out_f, _LANE)
        w_t = (jnp.zeros((in_p, out_p), jnp.float32)
               .at[:in_f, :out_f].set(w.T)).astype(jnp.bfloat16)
        b_p = jnp.zeros((1, out_p), jnp.float32).at[0, :out_f].set(b)
        packed.append((w_t, b_p))
    return packed


def _choose_batch_tiling(B, in_p, out_p, widths_p):
    """Pick (rows-per-tile, padded batch, grid steps) from a VMEM budget."""
    b_al = _round_up(B, _ROW_ALIGN)
    # Bytes per batch row resident in VMEM: double-buffered bf16 x tile,
    # double-buffered f32 out tile, plus widest f32 intermediate activation.
    per_row = 2 * in_p * 2 + 2 * out_p * 4 + 6 * max(widths_p)
    cap = (_TILE_VMEM_BUDGET // per_row) // _ROW_ALIGN * _ROW_ALIGN
    cap = max(_ROW_ALIGN, min(cap, _MAX_BATCH_TILE))
    n_steps = pl.cdiv(b_al, cap)
    # Guarantee >=2 grid steps when there is more than one row-tile of work so
    # v7x's two TensorCores both run ("parallel" only shards with >=2 steps).
    if n_steps == 1 and b_al > _ROW_ALIGN:
        n_steps = 2
    tm = _round_up(pl.cdiv(b_al, n_steps), _ROW_ALIGN)
    return tm, tm * n_steps, n_steps


def mlp_forward(packed_params, x, out_features):
    """Matches MLP.forward: [Linear+ReLU]*len(hidden_layers) then final
    Linear, fused into a single Pallas kernel."""
    n_layers = len(packed_params)
    B, in_f = x.shape
    in_p = packed_params[0][0].shape[0]
    out_p = packed_params[-1][0].shape[1]
    widths_p = [in_p] + [w.shape[1] for w, _ in packed_params]

    tm, b_pad, n_steps = _choose_batch_tiling(B, in_p, out_p, widths_p)

    # Cast once to bf16 (MXU-native, halves x DMA bytes).  Skip the pad pass
    # entirely when both the rows and the feature dim are already aligned.
    x_bf = x if x.dtype == jnp.bfloat16 else x.astype(jnp.bfloat16)
    if B != b_pad or in_f != in_p:
        x_in = jnp.zeros((b_pad, in_p), jnp.bfloat16).at[:B, :in_f].set(x_bf)
    else:
        x_in = x_bf

    in_specs = [pl.BlockSpec((tm, in_p), lambda i: (i, 0))]
    operands = [x_in]
    vmem_bytes = 2 * tm * in_p * 2 + 2 * tm * out_p * 4 + 6 * tm * max(widths_p)
    for w_t, b_p in packed_params:
        k_in, k_out = w_t.shape
        in_specs.append(pl.BlockSpec((k_in, k_out), lambda i: (0, 0)))
        in_specs.append(pl.BlockSpec((1, k_out), lambda i: (0, 0)))
        operands.append(w_t)
        operands.append(b_p)
        vmem_bytes += 2 * (k_in * k_out * 2 + k_out * 4)

    # Explicit scoped-VMEM limit: >= actual need (with 2x headroom), capped
    # safely below v7x's 64 MiB physical VMEM; also covers v5e's 16 MiB default.
    vmem_limit = int(min(max(2 * vmem_bytes, 32 << 20), 60 << 20))

    kernel = functools.partial(_fused_mlp_kernel, n_layers=n_layers)
    y = pl.pallas_call(
        kernel,
        out_shape=jax.ShapeDtypeStruct((b_pad, out_p), jnp.float32),
        grid_spec=pltpu.PrefetchScalarGridSpec(
            num_scalar_prefetch=0,
            grid=(n_steps,),
            in_specs=in_specs,
            out_specs=pl.BlockSpec((tm, out_p), lambda i: (i, 0)),
        ),
        compiler_params=pltpu.CompilerParams(
            dimension_semantics=("parallel",),
            vmem_limit_bytes=vmem_limit,
        ),
    )(*operands)

    # Skip the slice pass when the output is already exactly shaped.
    if B == b_pad and out_features == out_p:
        return y
    return y[:B, :out_features]


# Forward jitted once; out_features is static (it only sets the final slice).
mlp_forward_jit = jax.jit(mlp_forward, static_argnums=2)


def init_mlp_params(key, input_size, hidden_layers, output_size):
    """Deterministic init mimicking nn.Linear default (uniform +/- 1/sqrt(fan_in)).
    Weights stored PyTorch-style as (out_features, in_features)."""
    sizes = [input_size] + list(hidden_layers) + [output_size]
    params = []
    for i in range(len(sizes) - 1):
        fan_in, fan_out = sizes[i], sizes[i + 1]
        key, wk, bk = jax.random.split(key, 3)
        bound = 1.0 / jnp.sqrt(fan_in)
        w = jax.random.uniform(wk, (fan_out, fan_in), jnp.float32, -bound, bound)
        b = jax.random.uniform(bk, (fan_out,), jnp.float32, -bound, bound)
        params.append((w, b))
    return params


def mlp_reference(params, x):
    """Pure-JAX f32 reference for validation (uses original (Out, In) weights)."""
    n = len(params)
    h = x
    for i, (w, b) in enumerate(params):
        h = h @ w.T + b
        if i < n - 1:
            h = jnp.maximum(h, 0.0)
    return h


if __name__ == "__main__":
    key = jax.random.PRNGKey(0)

    # Small shapes consistent with the module: MLP(32, [64, 32], 8)
    batch = 8
    input_size = 32
    hidden_layers = [64, 32]
    output_size = 8

    pkey, xkey = jax.random.split(key)
    params = init_mlp_params(pkey, input_size, hidden_layers, output_size)
    x = jax.random.normal(xkey, (batch, input_size), jnp.float32)

    packed = pack_params(params)   # one-time transpose + 128-lane pad + bf16 cast
    out = mlp_forward_jit(packed, x, output_size)
    out = jax.block_until_ready(out)

    ref = mlp_reference(params, x)
    assert out.shape == (batch, output_size)
    # bf16 matmul datapath with f32 accumulation -> ~1e-2 relative accuracy.
    assert jnp.allclose(out, ref, atol=3e-2, rtol=3e-2), "mismatch vs reference"

    print("KERNEL_OK")
</pallas_src>

<mosaic_0001>
module attributes {stable_mosaic.version = 11 : i64} {
  func.func @_fused_mlp_kernel(%arg0: i32, %arg1: memref<16x128xbf16, #tpu.memory_space<vmem>>, %arg2: memref<128x128xbf16, #tpu.memory_space<vmem>>, %arg3: memref<1x128xf32, #tpu.memory_space<vmem>>, %arg4: memref<128x128xbf16, #tpu.memory_space<vmem>>, %arg5: memref<1x128xf32, #tpu.memory_space<vmem>>, %arg6: memref<128x128xbf16, #tpu.memory_space<vmem>>, %arg7: memref<1x128xf32, #tpu.memory_space<vmem>>, %arg8: memref<16x128xf32, #tpu.memory_space<vmem>>) attributes {dimension_semantics = [#tpu.dimension_semantics<parallel>], iteration_bounds = array<i64: 1>, scalar_prefetch = 0 : i64, scratch_operands = 0 : i64, tpu.core_type = #tpu.core_type<tc>, window_params = [{transform_indices = @transform_0, window_bounds = array<i64: 16, 128>}, {pipeline_mode = #tpu.pipeline_mode<synchronous>, transform_indices = @transform_1, window_bounds = array<i64: 128, 128>}, {pipeline_mode = #tpu.pipeline_mode<synchronous>, transform_indices = @transform_2, window_bounds = array<i64: 1, 128>}, {pipeline_mode = #tpu.pipeline_mode<synchronous>, transform_indices = @transform_3, window_bounds = array<i64: 128, 128>}, {pipeline_mode = #tpu.pipeline_mode<synchronous>, transform_indices = @transform_4, window_bounds = array<i64: 1, 128>}, {pipeline_mode = #tpu.pipeline_mode<synchronous>, transform_indices = @transform_5, window_bounds = array<i64: 128, 128>}, {pipeline_mode = #tpu.pipeline_mode<synchronous>, transform_indices = @transform_6, window_bounds = array<i64: 1, 128>}, {transform_indices = @transform_7, window_bounds = array<i64: 16, 128>}]} {
    %c0 = arith.constant 0 : index
    %c0_0 = arith.constant 0 : index
    %0 = vector.load %arg1[%c0, %c0_0] : memref<16x128xbf16, #tpu.memory_space<vmem>>, vector<16x128xbf16>
    %c0_1 = arith.constant 0 : index
    %c0_2 = arith.constant 0 : index
    %1 = vector.load %arg2[%c0_1, %c0_2] : memref<128x128xbf16, #tpu.memory_space<vmem>>, vector<128x128xbf16>
    %cst = arith.constant dense<0.000000e+00> : vector<16x128xf32>
    %2 = tpu.matmul %0, %1, %cst {dimension_numbers = #tpu.dot_dimension_numbers<[1], [0], [0], [1], [0, 0, 1, 1], [], []>} : vector<16x128xbf16>, vector<128x128xbf16>, vector<16x128xf32> -> vector<16x128xf32>
    %c0_3 = arith.constant 0 : index
    %c0_4 = arith.constant 0 : index
    %3 = vector.load %arg3[%c0_3, %c0_4] : memref<1x128xf32, #tpu.memory_space<vmem>>, vector<1x128xf32>
    %4 = vector.broadcast %3 : vector<1x128xf32> to vector<16x128xf32>
    %5 = arith.addf %2, %4 : vector<16x128xf32>
    %cst_5 = arith.constant 0.000000e+00 : f32
    %6 = vector.broadcast %cst_5 : f32 to vector<16x128xf32>
    %7 = arith.maximumf %5, %6 : vector<16x128xf32>
    %8 = arith.truncf %7 : vector<16x128xf32> to vector<16x128xbf16>
    %c0_6 = arith.constant 0 : index
    %c0_7 = arith.constant 0 : index
    %9 = vector.load %arg4[%c0_6, %c0_7] : memref<128x128xbf16, #tpu.memory_space<vmem>>, vector<128x128xbf16>
    %cst_8 = arith.constant dense<0.000000e+00> : vector<16x128xf32>
    %10 = tpu.matmul %8, %9, %cst_8 {dimension_numbers = #tpu.dot_dimension_numbers<[1], [0], [0], [1], [0, 0, 1, 1], [], []>} : vector<16x128xbf16>, vector<128x128xbf16>, vector<16x128xf32> -> vector<16x128xf32>
    %c0_9 = arith.constant 0 : index
    %c0_10 = arith.constant 0 : index
    %11 = vector.load %arg5[%c0_9, %c0_10] : memref<1x128xf32, #tpu.memory_space<vmem>>, vector<1x128xf32>
    %12 = vector.broadcast %11 : vector<1x128xf32> to vector<16x128xf32>
    %13 = arith.addf %10, %12 : vector<16x128xf32>
    %cst_11 = arith.constant 0.000000e+00 : f32
    %14 = vector.broadcast %cst_11 : f32 to vector<16x128xf32>
    %15 = arith.maximumf %13, %14 : vector<16x128xf32>
    %16 = arith.truncf %15 : vector<16x128xf32> to vector<16x128xbf16>
    %c0_12 = arith.constant 0 : index
    %c0_13 = arith.constant 0 : index
    %17 = vector.load %arg6[%c0_12, %c0_13] : memref<128x128xbf16, #tpu.memory_space<vmem>>, vector<128x128xbf16>
    %cst_14 = arith.constant dense<0.000000e+00> : vector<16x128xf32>
    %18 = tpu.matmul %16, %17, %cst_14 {dimension_numbers = #tpu.dot_dimension_numbers<[1], [0], [0], [1], [0, 0, 1, 1], [], []>} : vector<16x128xbf16>, vector<128x128xbf16>, vector<16x128xf32> -> vector<16x128xf32>
    %c0_15 = arith.constant 0 : index
    %c0_16 = arith.constant 0 : index
    %19 = vector.load %arg7[%c0_15, %c0_16] : memref<1x128xf32, #tpu.memory_space<vmem>>, vector<1x128xf32>
    %20 = vector.broadcast %19 : vector<1x128xf32> to vector<16x128xf32>
    %21 = arith.addf %18, %20 : vector<16x128xf32>
    %c0_17 = arith.constant 0 : index
    %c0_18 = arith.constant 0 : index
    %22 = vector.load %arg8[%c0_17, %c0_18] : memref<16x128xf32, #tpu.memory_space<vmem>>, vector<16x128xf32>
    tpu.vector_store %arg8[%c0_17, %c0_18], %21 {strides = array<i32>} : memref<16x128xf32, #tpu.memory_space<vmem>>, vector<16x128xf32>,
    return
  }
  func.func @transform_0(%arg0: i32) -> (i32, i32) {
    %c0_i32 = arith.constant 0 : i32
    %c0_i32_0 = arith.constant 0 : i32
    return %arg0, %c0_i32 : i32, i32
  }
  func.func @transform_1(%arg0: i32) -> (i32, i32) {
    %c0_i32 = arith.constant 0 : i32
    %c0_i32_0 = arith.constant 0 : i32
    %c0_i32_1 = arith.constant 0 : i32
    return %c0_i32, %c0_i32_0 : i32, i32
  }
  func.func @transform_2(%arg0: i32) -> (i32, i32) {
    %c0_i32 = arith.constant 0 : i32
    %c0_i32_0 = arith.constant 0 : i32
    %c0_i32_1 = arith.constant 0 : i32
    return %c0_i32, %c0_i32_0 : i32, i32
  }
  func.func @transform_3(%arg0: i32) -> (i32, i32) {
    %c0_i32 = arith.constant 0 : i32
    %c0_i32_0 = arith.constant 0 : i32
    %c0_i32_1 = arith.constant 0 : i32
    return %c0_i32, %c0_i32_0 : i32, i32
  }
  func.func @transform_4(%arg0: i32) -> (i32, i32) {
    %c0_i32 = arith.constant 0 : i32
    %c0_i32_0 = arith.constant 0 : i32
    %c0_i32_1 = arith.constant 0 : i32
    return %c0_i32, %c0_i32_0 : i32, i32
  }
  func.func @transform_5(%arg0: i32) -> (i32, i32) {
    %c0_i32 = arith.constant 0 : i32
    %c0_i32_0 = arith.constant 0 : i32
    %c0_i32_1 = arith.constant 0 : i32
    return %c0_i32, %c0_i32_0 : i32, i32
  }
  func.func @transform_6(%arg0: i32) -> (i32, i32) {
    %c0_i32 = arith.constant 0 : i32
    %c0_i32_0 = arith.constant 0 : i32
    %c0_i32_1 = arith.constant 0 : i32
    return %c0_i32, %c0_i32_0 : i32, i32
  }
  func.func @transform_7(%arg0: i32) -> (i32, i32) {
    %c0_i32 = arith.constant 0 : i32
    %c0_i32_0 = arith.constant 0 : i32
    return %arg0, %c0_i32 : i32, i32
  }
}

</mosaic_0001>

<bundles_post_ra>
// kernel: mlp_forward.1
= control target key start
LH: loop header
LB: loop body
LE: loop exit
PB: predicated region body
PF: predicated region fallthrough
CT: control target
= control target key end

     0   :  { %12 = vsyncpa [#allocation3], 0  ;;  %s622_s0 = inlined_call_operand.vmem [shape: bf16[16,128], index: 0, kind: input, shape index: {}]   ;;  %s623_s1 = inlined_call_operand.hbm [shape: bf16[128,128], index: 1, kind: input, shape index: {}]   ;;  %s624_s2 = inlined_call_operand.vmem [shape: f32[1,128], index: 2, kind: input, shape index: {}]   ;;  %s625_s3 = inlined_call_operand.hbm [shape: bf16[128,128], index: 3, kind: input, shape index: {}]   ;;  %s626_s4 = inlined_call_operand.vmem [shape: f32[1,128], index: 4, kind: input, shape index: {}]   ;;  %s627_s5 = inlined_call_operand.hbm [shape: bf16[128,128], index: 5, kind: input, shape index: {}]   ;;  %s628_s6 = inlined_call_operand.vmem [shape: f32[1,128], index: 6, kind: input, shape index: {}]   ;;  %s629_s7 = inlined_call_operand.vmem [shape: f32[16,128], index: 7, kind: output, shape index: {}]  }
   0x1   :  { %13 = vsyncpa [#allocation5], 0  ;;  %s35_s26 = sshll.u32 %s625_s3, 4  ;;  %s550_s27 = smov [#allocation4]   ;;  %s36_s26 = int_to_ptr.hbm [resolvable:$true] %s35_s26 }
   0x2   :  { %s37_s28 = sshll.u32 %s550_s27, 4  ;;  %s20_s8 = sshll.u32 %s623_s1, 4  ;;  %s38_s28 = int_to_ptr.vmem [resolvable:$true] %s37_s28  ;;  %s21_s8 = int_to_ptr.hbm [resolvable:$true] %s20_s8 }
   0x3   :  { %s551_s9 = smov 64   ;;  %s552_s10 = smov 4  }
   0x4   :  { %43 = dma.hbm_to_vmem [thread:$0]  %s36_s26, 1024, %s38_s28, [#allocation5], %s551_s9, %s551_s9, %s552_s10  }
   0x5   :  { %s553_s11 = smov [#allocation2]   ;;  %s50_s15 = sshll.u32 %s627_s5, 4  ;;  %s51_s15 = int_to_ptr.hbm [resolvable:$true] %s50_s15 }
   0x6   :  { %s22_s12 = sshll.u32 %s553_s11, 4  ;;  %s554_s3 = smov [#allocation6]   ;;  %s23_s12 = int_to_ptr.vmem [resolvable:$true] %s22_s12 }
   0x7   :  { %28 = dma.hbm_to_vmem [thread:$0]  %s21_s8, 1024, %s23_s12, [#allocation3], %s551_s9, %s551_s9, %s552_s10  }
   0x8   :  { %s52_s16 = sshll.u32 %s554_s3, 4  ;;  %s53_s16 = int_to_ptr.vmem [resolvable:$true] %s52_s16 }
   0x9   :  { %58 = dma.hbm_to_vmem [thread:$0]  %s51_s15, 1024, %s53_s16, [#allocation5], %s551_s9, %s551_s9, %s552_s10  }
   0xa   :  { %546 = dma.done.wait [#allocation3], 1024  }
   0xb   :  { %547 = vsyncadd [#allocation3], 4294966272 }
   0xc   :  { %548 = dma.done.wait [#allocation5], 2048  }
   0xd   :  { %549 = vsyncadd [#allocation5], 4294965248  ;;  %v449_v0 = vld [vmem:[#allocation2 + $0x38] sm:$0xff]  ;;  %v448_v1 = vld [vmem:[#allocation2 + $0x30] sm:$0xff] }
   0xe   :  { %149 = vmatpush.bf16.msra.mxu0 %v449_v0  ;;  %v457_v2 = vld [vmem:[#allocation4 + $0x38] sm:$0xff]  ;;  %v456_v3 = vld [vmem:[#allocation4 + $0x30] sm:$0xff]  ;;  %v447_v4 = vld [vmem:[#allocation2 + $0x28] sm:$0xff] }
   0xf   :  { %234 = vmatpush.bf16.msra.mxu1 %v457_v2  ;;  %v455_v5 = vld [vmem:[#allocation4 + $0x28] sm:$0xff]  ;;  %v446_v6 = vld [vmem:[#allocation2 + $0x20] sm:$0xff]  ;;  %v445_v8 = vld [vmem:[#allocation2 + $0x18] sm:$0xff] }
  0x10   :  { %v454_v7 = vld [vmem:[#allocation4 + $0x20] sm:$0xff]  ;;  %v444_v9 = vld [vmem:[#allocation2 + $0x10] sm:$0xff]  ;;  %v443_v10 = vld [vmem:[#allocation2 + $0x8] sm:$0xff] }
  0x11   :  { %v442_v11 = vld [vmem:[#allocation2] sm:$0xff]  ;;  %v453_v13 = vld [vmem:[#allocation4 + $0x18] sm:$0xff]  ;;  %v452_v14 = vld [vmem:[#allocation4 + $0x10] sm:$0xff] }
  0x12   :  { %150 = vmatpush.bf16.msra.mxu0 %v448_v1  ;;  %v441_v12 = vld [vmem:[%s622_s0] sm:$0xff]  ;;  %v451_v15 = vld [vmem:[#allocation4 + $0x8] sm:$0xff]  ;;  %v465_v17 = vld [vmem:[#allocation6 + $0x38] sm:$0xff] }
  0x13   :  { %235 = vmatpush.bf16.msra.mxu1 %v456_v3  ;;  %v450_v16 = vld [vmem:[#allocation4] sm:$0xff]  ;;  %319 = vmatpush.bf16.msra.mxu2 %v465_v17  ;;  %v464_v18 = vld [vmem:[#allocation6 + $0x30] sm:$0xff]  ;;  %v463_v19 = vld [vmem:[#allocation6 + $0x28] sm:$0xff] }
  0x14   :  { %v462_v20 = vld [vmem:[#allocation6 + $0x20] sm:$0xff]  ;;  %v461_v29 = vld [vmem:[#allocation6 + $0x18] sm:$0xff]  ;;  %v460_v30 = vld [vmem:[#allocation6 + $0x10] sm:$0xff] }
  0x15   :  { %v471_v22 = vld [vmem:[%s624_s2] ss:$0 sm:$0xff]  ;;  %v459_v31 = vld [vmem:[#allocation6 + $0x8] sm:$0xff] }
  0x16   :  { %151 = vmatpush.bf16.msra.mxu0 %v447_v4  ;;  %v458_v32 = vld [vmem:[#allocation6] sm:$0xff] }
  0x17   :  { %236 = vmatpush.bf16.msra.mxu1 %v455_v5  ;;  %320 = vmatpush.bf16.msra.mxu2 %v464_v18  ;;  %v472_v34 = vld [vmem:[%s626_s4] ss:$0 sm:$0xff] }
  0x18   :  { %v473_v41 = vld [vmem:[%s628_s6] ss:$0 sm:$0xff] }
  0x1a   :  { %152 = vmatpush.bf16.msra.mxu0 %v446_v6 }
  0x1b   :  { %237 = vmatpush.bf16.msra.mxu1 %v454_v7  ;;  %321 = vmatpush.bf16.msra.mxu2 %v463_v19 }
  0x1e   :  { %153 = vmatpush.bf16.msra.mxu0 %v445_v8 }
  0x1f   :  { %238 = vmatpush.bf16.msra.mxu1 %v453_v13  ;;  %322 = vmatpush.bf16.msra.mxu2 %v462_v20 }
  0x22   :  { %154 = vmatpush.bf16.msra.mxu0 %v444_v9 }
  0x23   :  { %239 = vmatpush.bf16.msra.mxu1 %v452_v14  ;;  %323 = vmatpush.bf16.msra.mxu2 %v461_v29 }
  0x26   :  { %155 = vmatpush.bf16.msra.mxu0 %v443_v10 }
  0x27   :  { %240 = vmatpush.bf16.msra.mxu1 %v451_v15  ;;  %324 = vmatpush.bf16.msra.mxu2 %v460_v30 }
  0x2a   :  { %156 = vmatpush.bf16.msra.mxu0 %v442_v11 }
  0x2b   :  { %241 = vmatpush.bf16.msra.mxu1 %v450_v16  ;;  %325 = vmatpush.bf16.msra.mxu2 %v459_v31 }
  0x2d   :  { %157 = vmatmul.bf16.vlgmr.msra.gmra.mxu0 %v441_v12 }
  0x2f   :  { %326 = vmatpush.bf16.msra.mxu2 %v458_v32 }
  0xaa   :  { %v158_v21 = vpop.f32.mrf.mxu0 }
  0xab   :  { %v159_v23 = vadd.f32 %v471_v22, %v158_v21 }
  0xad   :  { %v163_v26 = vmax.f32 %v159_v23, 0.0 }
  0xb2   :  { %v160_v24 = vpop.f32.mrf.mxu0 }
  0xb3   :  { %v161_v25 = vadd.f32 %v471_v22, %v160_v24 }
  0xb5   :  { %v164_v27 = vmax.f32 %v161_v25, 0.0 }
  0xb7   :  { %v165_v28 = vpack.c.bf16 %v164_v27, %v163_v26 }
  0xb9   :  { %242 = vmatmul.bf16.vlgmr.msra.gmra.mxu1 %v165_v28 }
 0x136   :  { %v243_v33 = vpop.f32.mrf.mxu1 }
 0x137   :  { %v244_v35 = vadd.f32 %v472_v34, %v243_v33 }
 0x139   :  { %v248_v38 = vmax.f32 %v244_v35, 0.0 }
 0x13e   :  { %v245_v36 = vpop.f32.mrf.mxu1 }
 0x13f   :  { %v246_v37 = vadd.f32 %v472_v34, %v245_v36 }
 0x141   :  { %v249_v39 = vmax.f32 %v246_v37, 0.0 }
 0x143   :  { %v250_v40 = vpack.c.bf16 %v249_v39, %v248_v38 }
 0x145   :  { %327 = vmatmul.bf16.vlgmr.msra.gmra.mxu2 %v250_v40 }
 0x1c8   :  { %v328_v42 = vpop.f32.mrf.mxu2 }
 0x1c9   :  { %v329_v43 = vadd.f32 %v473_v41, %v328_v42 }
 0x1cb   :  { %333 = vst [vmem:[%s629_s7] sm:$0xff] %v329_v43 }
 0x1d0   :  { %v330_v44 = vpop.f32.mrf.mxu2 }
 0x1d1   :  { %v331_v45 = vadd.f32 %v473_v41, %v330_v44 }
 0x1d3   :  { %334 = vst [vmem:[%s629_s7 + $0x8] sm:$0xff] %v331_v45 }
 0x1d4   :  { %339 = vsyncpa [#allocation3], 1 }
 0x1d5   :  { %340 = vsyncpa [#allocation5], 1 }

</bundles_post_ra>
